<compile_context>
chip_gen: v7x
topology: tpu7x:2x2x1
jax: 0.10.0
libtpu: 0.0.40
codegen_flags: <defaults>
</compile_context>

<pallas_src>
import functools

import jax
import jax.numpy as jnp
from jax.experimental import pallas as pl
from jax.experimental.pallas import tpu as pltpu


def _gateconv_bn_kernel(x_ref, w_ref, gamma_ref, beta_ref, o_ref,
                        y_ref, sum_ref, ssq_ref, *, inv_m, eps, tm):
    phase = pl.program_id(0)   # 0: matmul + stats accumulation, 1: BN apply
    ti = pl.program_id(1)      # M-tile index

    @pl.when(jnp.logical_and(phase == 0, ti == 0))
    def _init():
        sum_ref[...] = jnp.zeros_like(sum_ref)
        ssq_ref[...] = jnp.zeros_like(ssq_ref)

    start = pl.multiple_of(ti * tm, tm)   # lane-aligned (tm is a multiple of 128)

    @pl.when(phase == 0)
    def _matmul_and_stats():
        # 1x1 conv tile as an MXU matmul: (Cout, Cin) @ (Cin, TM) -> (Cout, TM).
        y = jnp.dot(w_ref[...], x_ref[...], preferred_element_type=jnp.float32)
        y_ref[:, pl.ds(start, tm)] = y
        # Raw moments in f32.  Zero-padded columns contribute exactly 0, so
        # dividing by the true M later gives the exact batch mean / E[y^2].
        sum_ref[...] += jnp.sum(y, axis=1, keepdims=True)
        ssq_ref[...] += jnp.sum(y * y, axis=1, keepdims=True)

    @pl.when(phase == 1)
    def _bn_apply():
        # Recomputing scale/shift per tile is ~Cout=48 VPU/EUP lanes of work —
        # negligible, and avoids extra scratch / ordering gates.
        mean = sum_ref[...] * inv_m
        # E[y^2] - mean^2: post-conv activations have near-zero mean here, so
        # cancellation is benign with f32 accumulation (eps=1e-3 dominates).
        var = ssq_ref[...] * inv_m - mean * mean
        scale = gamma_ref[...] * jax.lax.rsqrt(var + eps)       # (Cout, 1)
        shift = beta_ref[...] - mean * scale                    # (Cout, 1)
        y = y_ref[:, pl.ds(start, tm)]
        o_ref[...] = (y * scale + shift).astype(o_ref.dtype)    # no yc temp


def sigmoid_mul_conv_bn(x_nchw, gate_nchw, weight_oihw, gamma, beta, *,
                        eps=1e-3, tm=640, compute_dtype=jnp.bfloat16):
    n, cin, h, w = x_nchw.shape
    cout = weight_oihw.shape[0]
    assert gate_nchw.shape == (1, cin, 1, 1)
    mtot = n * h * w

    # ---- channel-major view (Cin, M) -------------------------------------
    if n == 1:
        x2 = x_nchw.reshape(cin, mtot)                 # free reshape for NCHW, N=1
    else:
        # TODO(synk): for N>1 replace this materializing transpose with a batch
        # grid axis (Squeezed batch dim in the BlockSpec) so the strided read is
        # done by the DMA instead of an extra HBM copy.
        x2 = jnp.transpose(x_nchw, (1, 0, 2, 3)).reshape(cin, mtot)

    # ---- tile size / padding ---------------------------------------------
    m128 = pl.cdiv(mtot, 128) * 128
    tm = max(128, min((tm // 128) * 128, m128))        # lane-aligned tile
    nm = pl.cdiv(mtot, tm)                             # tiles per phase
    m_pad = nm * tm                                    # padded M (x only)

    # bf16 activations for the matmul (f32 accumulation inside the kernel).
    # In the surrounding network the producer would already emit bf16, making
    # this cast a no-op; pad with zeros so batch statistics stay exact.
    x_in = x2.astype(compute_dtype)
    if m_pad != mtot:
        x_in = jnp.pad(x_in, ((0, 0), (0, m_pad - mtot)))

    # Fold the sigmoid gate into the conv weight (tiny Cout x Cin op), then bf16.
    gate = jax.nn.sigmoid(gate_nchw.reshape(cin)).astype(jnp.float32)
    w2 = (weight_oihw.reshape(cout, cin).astype(jnp.float32)
          * gate[None, :]).astype(compute_dtype)

    gamma2 = gamma.reshape(cout, 1).astype(jnp.float32)
    beta2 = beta.reshape(cout, 1).astype(jnp.float32)

    # ---- VMEM accounting (double-buffered blocks + scratch) ---------------
    x_item = jnp.dtype(compute_dtype).itemsize
    vmem_needed = (2 * cin * tm * x_item          # x tile (double-buffered)
                   + 2 * cout * cin * x_item      # folded weight
                   + 2 * cout * tm * 4            # out tile (double-buffered)
                   + cout * m_pad * 4             # y scratch (grows with M)
                   + 8 * cout * 4                 # gamma/beta/stat scratch
                   + (1 << 20))                   # slack for in-kernel temps
    try:
        vmem_cap = pltpu.get_tpu_info().vmem_capacity_bytes
    except Exception:  # not on TPU / older jax: assume the smallest (v7x) VMEM
        vmem_cap = 64 * 1024 * 1024
    vmem_limit = min(32 * 1024 * 1024, vmem_cap // 2)
    assert vmem_needed < vmem_limit, (
        "kernel working set exceeds VMEM budget; reduce tm")

    grid = (2, nm)
    out2 = pl.pallas_call(
        functools.partial(_gateconv_bn_kernel,
                          inv_m=1.0 / mtot, eps=eps, tm=tm),
        out_shape=jax.ShapeDtypeStruct((cout, mtot), jnp.float32),
        grid=grid,
        in_specs=[
            # x: walk tiles in phase 0, stick to the last tile in phase 1 so
            # no DMA is re-issued (unchanged block index => copy elided).
            pl.BlockSpec((cin, tm),
                         lambda p, i, nm=nm: (0, i + p * (nm - 1 - i))),
            pl.BlockSpec((cout, cin), lambda p, i: (0, 0)),
            pl.BlockSpec((cout, 1), lambda p, i: (0, 0)),
            pl.BlockSpec((cout, 1), lambda p, i: (0, 0)),
        ],
        # out: stick to tile 0 during phase 0 (never written there, never
        # flushed), walk tiles during phase 1 so writeback overlaps the apply.
        out_specs=pl.BlockSpec((cout, tm), lambda p, i: (0, i * p)),
        scratch_shapes=[
            pltpu.VMEM((cout, m_pad), jnp.float32),   # y, resident across phases
            pltpu.VMEM((cout, 1), jnp.float32),       # per-channel sum
            pltpu.VMEM((cout, 1), jnp.float32),       # per-channel sum of squares
        ],
        compiler_params=pltpu.CompilerParams(
            dimension_semantics=("arbitrary", "arbitrary"),
            vmem_limit_bytes=vmem_limit),
    )(x_in, w2, gamma2, beta2)

    if n == 1:
        return out2.reshape(1, cout, h, w)
    return jnp.transpose(out2.reshape(cout, n, h, w), (1, 0, 2, 3))


def _reference(x, g, weight, gamma, beta, eps):
    cout, cin = weight.shape[0], weight.shape[1]
    xs = jax.nn.sigmoid(g) * x
    y = jnp.einsum("nchw,oc->nohw", xs, weight.reshape(cout, cin))
    mean = y.mean(axis=(0, 2, 3), keepdims=True)
    var = y.var(axis=(0, 2, 3), keepdims=True)   # biased, matches training BN
    return (gamma.reshape(1, -1, 1, 1) * (y - mean) * jax.lax.rsqrt(var + eps)
            + beta.reshape(1, -1, 1, 1))


if __name__ == "__main__":
    # Channels fixed by the module (Cin=288 -> Cout=48); reduced spatial extent
    # (real module is 56x56 -> M=3136, default tm=640 -> 5 tiles per phase).
    N, CIN, COUT, H, W = 1, 288, 48, 16, 16
    EPS = 1e-3

    key = jax.random.PRNGKey(0)
    k_x, k_g, k_w, k_gamma, k_beta = jax.random.split(key, 5)

    x73 = jax.random.normal(k_x, (N, CIN, H, W), dtype=jnp.float32)
    x77 = jax.random.normal(k_g, (1, CIN, 1, 1), dtype=jnp.float32)

    conv_w = jax.random.normal(k_w, (COUT, CIN, 1, 1), dtype=jnp.float32) * 0.05
    bn_gamma = 1.0 + 0.1 * jax.random.normal(k_gamma, (COUT,), dtype=jnp.float32)
    bn_beta = 0.1 * jax.random.normal(k_beta, (COUT,), dtype=jnp.float32)

    # TODO(synk): BatchNorm running_mean/running_var (momentum) buffer updates
    # are a training-mode side effect of the PyTorch module and are not returned.

    # tm=128 so the small demo exercises the multi-tile two-phase path
    # (M=256 -> 2 tiles per phase, grid=(2,2)).
    out = sigmoid_mul_conv_bn(x73, x77, conv_w, bn_gamma, bn_beta,
                              eps=EPS, tm=128)
    out = jax.block_until_ready(out)

    ref = _reference(x73, x77, conv_w, bn_gamma, bn_beta, EPS)
    assert out.shape == (N, COUT, H, W)
    # bf16 activations/weights in the MXU -> looser tolerance than pure f32.
    assert jnp.allclose(out, ref, atol=5e-2, rtol=5e-2), "mismatch vs reference"

    print("KERNEL_OK")
</pallas_src>

<mosaic_0001>
module attributes {stable_mosaic.version = 11 : i64} {
  func.func @_gateconv_bn_kernel(%arg0: i32, %arg1: i32, %arg2: memref<288x128xbf16, #tpu.memory_space<vmem>>, %arg3: memref<48x288xbf16, #tpu.memory_space<vmem>>, %arg4: memref<48x1xf32, #tpu.memory_space<vmem>>, %arg5: memref<48x1xf32, #tpu.memory_space<vmem>>, %arg6: memref<48x128xf32, #tpu.memory_space<vmem>>, %arg7: memref<48x256xf32, #tpu.memory_space<vmem>>, %arg8: memref<48x1xf32, #tpu.memory_space<vmem>>, %arg9: memref<48x1xf32, #tpu.memory_space<vmem>>) attributes {dimension_semantics = [#tpu.dimension_semantics<arbitrary>, #tpu.dimension_semantics<arbitrary>], iteration_bounds = array<i64: 2, 2>, scalar_prefetch = 0 : i64, scratch_operands = 3 : i64, tpu.core_type = #tpu.core_type<tc>, window_params = [{transform_indices = @transform_0, window_bounds = array<i64: 288, 128>}, {pipeline_mode = #tpu.pipeline_mode<synchronous>, transform_indices = @transform_1, window_bounds = array<i64: 48, 288>}, {pipeline_mode = #tpu.pipeline_mode<synchronous>, transform_indices = @transform_2, window_bounds = array<i64: 48, 1>}, {pipeline_mode = #tpu.pipeline_mode<synchronous>, transform_indices = @transform_3, window_bounds = array<i64: 48, 1>}, {transform_indices = @transform_4, window_bounds = array<i64: 48, 128>}]} {
    %c0_i32 = arith.constant 0 : i32
    %0 = arith.cmpi eq, %arg0, %c0_i32 : i32
    %c0_i32_0 = arith.constant 0 : i32
    %1 = arith.cmpi eq, %arg1, %c0_i32_0 : i32
    %2 = arith.andi %0, %1 : i1
    %3 = arith.extui %2 : i1 to i32
    %c0_i32_1 = arith.constant 0 : i32
    %4 = arith.cmpi ne, %3, %c0_i32_1 : i32
    scf.if %4 {
      %cst = arith.constant 0.000000e+00 : f32
      %13 = vector.broadcast %cst : f32 to vector<48x1xf32>
      %c0 = arith.constant 0 : index
      %c0_5 = arith.constant 0 : index
      %14 = vector.load %arg8[%c0, %c0_5] : memref<48x1xf32, #tpu.memory_space<vmem>>, vector<48x1xf32>
      tpu.vector_store %arg8[%c0, %c0_5], %13 {strides = array<i32>} : memref<48x1xf32, #tpu.memory_space<vmem>>, vector<48x1xf32>,
      %cst_6 = arith.constant 0.000000e+00 : f32
      %15 = vector.broadcast %cst_6 : f32 to vector<48x1xf32>
      %c0_7 = arith.constant 0 : index
      %c0_8 = arith.constant 0 : index
      %16 = vector.load %arg9[%c0_7, %c0_8] : memref<48x1xf32, #tpu.memory_space<vmem>>, vector<48x1xf32>
      tpu.vector_store %arg9[%c0_7, %c0_8], %15 {strides = array<i32>} : memref<48x1xf32, #tpu.memory_space<vmem>>, vector<48x1xf32>,
    } else {
    }
    %c128_i32 = arith.constant 128 : i32
    %5 = arith.muli %arg1, %c128_i32 : i32
    %6 = tpu.assume_multiple %5, 128 : i32
    %c0_i32_2 = arith.constant 0 : i32
    %7 = arith.cmpi eq, %arg0, %c0_i32_2 : i32
    %8 = arith.extui %7 : i1 to i32
    %c0_i32_3 = arith.constant 0 : i32
    %9 = arith.cmpi ne, %8, %c0_i32_3 : i32
    scf.if %9 {
      %c0 = arith.constant 0 : index
      %c0_5 = arith.constant 0 : index
      %13 = vector.load %arg3[%c0, %c0_5] : memref<48x288xbf16, #tpu.memory_space<vmem>>, vector<48x288xbf16>
      %c0_6 = arith.constant 0 : index
      %c0_7 = arith.constant 0 : index
      %14 = vector.load %arg2[%c0_6, %c0_7] : memref<288x128xbf16, #tpu.memory_space<vmem>>, vector<288x128xbf16>
      %cst = arith.constant dense<0.000000e+00> : vector<48x128xf32>
      %15 = tpu.matmul %13, %14, %cst {dimension_numbers = #tpu.dot_dimension_numbers<[1], [0], [0], [1], [0, 0, 1, 1], [], []>} : vector<48x288xbf16>, vector<288x128xbf16>, vector<48x128xf32> -> vector<48x128xf32>
      %c0_8 = arith.constant 0 : index
      %16 = arith.index_cast %6 : i32 to index
      %17 = vector.load %arg7[%c0_8, %16] : memref<48x256xf32, #tpu.memory_space<vmem>>, vector<48x128xf32>
      tpu.vector_store %arg7[%c0_8, %16], %15 {strides = array<i32>} : memref<48x256xf32, #tpu.memory_space<vmem>>, vector<48x128xf32>,
      %c0_9 = arith.constant 0 : index
      %c0_10 = arith.constant 0 : index
      %18 = vector.load %arg8[%c0_9, %c0_10] : memref<48x1xf32, #tpu.memory_space<vmem>>, vector<48x1xf32>
      %cst_11 = arith.constant dense<0.000000e+00> : vector<48xf32>
      %19 = vector.multi_reduction <add>, %15, %cst_11 [1] : vector<48x128xf32> to vector<48xf32>
      %20 = vector.shape_cast %19 : vector<48xf32> to vector<48x1xf32>
      %21 = arith.addf %18, %20 : vector<48x1xf32>
      %c0_12 = arith.constant 0 : index
      %c0_13 = arith.constant 0 : index
      %22 = vector.load %arg8[%c0_12, %c0_13] : memref<48x1xf32, #tpu.memory_space<vmem>>, vector<48x1xf32>
      tpu.vector_store %arg8[%c0_12, %c0_13], %21 {strides = array<i32>} : memref<48x1xf32, #tpu.memory_space<vmem>>, vector<48x1xf32>,
      %c0_14 = arith.constant 0 : index
      %c0_15 = arith.constant 0 : index
      %23 = vector.load %arg9[%c0_14, %c0_15] : memref<48x1xf32, #tpu.memory_space<vmem>>, vector<48x1xf32>
      %24 = arith.mulf %15, %15 : vector<48x128xf32>
      %cst_16 = arith.constant dense<0.000000e+00> : vector<48xf32>
      %25 = vector.multi_reduction <add>, %24, %cst_16 [1] : vector<48x128xf32> to vector<48xf32>
      %26 = vector.shape_cast %25 : vector<48xf32> to vector<48x1xf32>
      %27 = arith.addf %23, %26 : vector<48x1xf32>
      %c0_17 = arith.constant 0 : index
      %c0_18 = arith.constant 0 : index
      %28 = vector.load %arg9[%c0_17, %c0_18] : memref<48x1xf32, #tpu.memory_space<vmem>>, vector<48x1xf32>
      tpu.vector_store %arg9[%c0_17, %c0_18], %27 {strides = array<i32>} : memref<48x1xf32, #tpu.memory_space<vmem>>, vector<48x1xf32>,
    } else {
    }
    %c1_i32 = arith.constant 1 : i32
    %10 = arith.cmpi eq, %arg0, %c1_i32 : i32
    %11 = arith.extui %10 : i1 to i32
    %c0_i32_4 = arith.constant 0 : i32
    %12 = arith.cmpi ne, %11, %c0_i32_4 : i32
    scf.if %12 {
      %c0 = arith.constant 0 : index
      %c0_5 = arith.constant 0 : index
      %13 = vector.load %arg8[%c0, %c0_5] : memref<48x1xf32, #tpu.memory_space<vmem>>, vector<48x1xf32>
      %cst = arith.constant 3.906250e-03 : f32
      %14 = vector.broadcast %cst : f32 to vector<48x1xf32>
      %15 = arith.mulf %13, %14 : vector<48x1xf32>
      %c0_6 = arith.constant 0 : index
      %c0_7 = arith.constant 0 : index
      %16 = vector.load %arg9[%c0_6, %c0_7] : memref<48x1xf32, #tpu.memory_space<vmem>>, vector<48x1xf32>
      %cst_8 = arith.constant 3.906250e-03 : f32
      %17 = vector.broadcast %cst_8 : f32 to vector<48x1xf32>
      %18 = arith.mulf %16, %17 : vector<48x1xf32>
      %19 = arith.mulf %15, %15 : vector<48x1xf32>
      %20 = arith.subf %18, %19 : vector<48x1xf32>
      %c0_9 = arith.constant 0 : index
      %c0_10 = arith.constant 0 : index
      %21 = vector.load %arg4[%c0_9, %c0_10] : memref<48x1xf32, #tpu.memory_space<vmem>>, vector<48x1xf32>
      %cst_11 = arith.constant 1.000000e-03 : f32
      %22 = vector.broadcast %cst_11 : f32 to vector<48x1xf32>
      %23 = arith.addf %20, %22 : vector<48x1xf32>
      %24 = math.rsqrt %23 : vector<48x1xf32>
      %25 = arith.mulf %21, %24 : vector<48x1xf32>
      %c0_12 = arith.constant 0 : index
      %c0_13 = arith.constant 0 : index
      %26 = vector.load %arg5[%c0_12, %c0_13] : memref<48x1xf32, #tpu.memory_space<vmem>>, vector<48x1xf32>
      %27 = arith.mulf %15, %25 : vector<48x1xf32>
      %28 = arith.subf %26, %27 : vector<48x1xf32>
      %c0_14 = arith.constant 0 : index
      %29 = arith.index_cast %6 : i32 to index
      %30 = vector.load %arg7[%c0_14, %29] : memref<48x256xf32, #tpu.memory_space<vmem>>, vector<48x128xf32>
      %31 = vector.broadcast %25 : vector<48x1xf32> to vector<48x128xf32>
      %32 = arith.mulf %30, %31 : vector<48x128xf32>
      %33 = vector.broadcast %28 : vector<48x1xf32> to vector<48x128xf32>
      %34 = arith.addf %32, %33 : vector<48x128xf32>
      %c0_15 = arith.constant 0 : index
      %c0_16 = arith.constant 0 : index
      %35 = vector.load %arg6[%c0_15, %c0_16] : memref<48x128xf32, #tpu.memory_space<vmem>>, vector<48x128xf32>
      tpu.vector_store %arg6[%c0_15, %c0_16], %34 {strides = array<i32>} : memref<48x128xf32, #tpu.memory_space<vmem>>, vector<48x128xf32>,
    } else {
    }
    return
  }
  func.func @transform_0(%arg0: i32, %arg1: i32) -> (i32, i32) {
    %c1_i32 = arith.constant 1 : i32
    %0 = arith.subi %c1_i32, %arg1 : i32
    %1 = arith.muli %arg0, %0 : i32
    %2 = arith.addi %arg1, %1 : i32
    %c0_i32 = arith.constant 0 : i32
    %c0_i32_0 = arith.constant 0 : i32
    return %c0_i32, %2 : i32, i32
  }
  func.func @transform_1(%arg0: i32, %arg1: i32) -> (i32, i32) {
    %c0_i32 = arith.constant 0 : i32
    %c0_i32_0 = arith.constant 0 : i32
    %c0_i32_1 = arith.constant 0 : i32
    return %c0_i32, %c0_i32_0 : i32, i32
  }
  func.func @transform_2(%arg0: i32, %arg1: i32) -> (i32, i32) {
    %c0_i32 = arith.constant 0 : i32
    %c0_i32_0 = arith.constant 0 : i32
    %c0_i32_1 = arith.constant 0 : i32
    return %c0_i32, %c0_i32_0 : i32, i32
  }
  func.func @transform_3(%arg0: i32, %arg1: i32) -> (i32, i32) {
    %c0_i32 = arith.constant 0 : i32
    %c0_i32_0 = arith.constant 0 : i32
    %c0_i32_1 = arith.constant 0 : i32
    return %c0_i32, %c0_i32_0 : i32, i32
  }
  func.func @transform_4(%arg0: i32, %arg1: i32) -> (i32, i32) {
    %0 = arith.muli %arg1, %arg0 : i32
    %c0_i32 = arith.constant 0 : i32
    %c0_i32_0 = arith.constant 0 : i32
    return %c0_i32, %0 : i32, i32
  }
}

</mosaic_0001>

<bundles_post_ra>
// kernel: tpu_custom_call.1
= control target key start
LH: loop header
LB: loop body
LE: loop exit
PB: predicated region body
PF: predicated region fallthrough
CT: control target
= control target key end

     0   :  { %s1773_s0 = inlined_call_operand.hbm [shape: bf16[288,256], index: 0, kind: input, shape index: {}]   ;;  %s1774_s1 = inlined_call_operand.vmem [shape: bf16[48,288], index: 1, kind: input, shape index: {}]   ;;  %s1775_s2 = inlined_call_operand.vmem [shape: f32[48,1], index: 2, kind: input, shape index: {}]   ;;  %s1776_s3 = inlined_call_operand.vmem [shape: f32[48,1], index: 3, kind: input, shape index: {}]   ;;  %s1777_s4 = inlined_call_operand.hbm [shape: f32[48,256], index: 4, kind: output, shape index: {}]  }
   0x1   :  { %1782 = sst [smem:[#allocation13_spill]] %s1777_s4 }
   0x2   :  { %9 = vsyncpa [#allocation6], 0 }
   0x3   :  { %11 = vsyncpa [#allocation6 + $0x1], 0 }
   0x4   :  { %12 = vsyncpa [#allocation7], 0 }
   0x5   :  { %14 = vsyncpa [#allocation7 + $0x1], 0  ;;  %s1390_s15 = smov 0   ;;  %s1392_s16 = smov 0  }
   0x6   :  { %s1394_s17 = smov 0   ;;  %s1396_s18 = smov 0  }
   0x7   :  { %s1398_s19 = smov 0   ;;  %s1400_s20 = smov 0  }
   0x8   :  { %s1402_s21 = smov 0   ;;  %s1404_s22 = smov 0  }
   0x9   :  { %s1406_s23 = smov 0   ;;  %s1408_s24 = smov 0  }
   0xa   :  { %s1410_s25 = smov 0  }
   0xb LB: > { %s941_s26 = sadd.s32 4294967295, %s1351_s25   ;;  %s29_s28 = sadd.s32 1, %s1343_s23  ;;  %s1351_s25 = sphi %s1410_s25, %s20_s25   ;;  %s1347_s24 = sphi %s1408_s24, %s1806_s24   ;;  %s1343_s23 = sphi %s1406_s23, %s1805_s23   ;;  %s1339_s22 = sphi %s1404_s22, %s1804_s22   ;;  %s1335_s21 = sphi %s1402_s21, %s1803_s21   ;;  %s1331_s20 = sphi %s1400_s20, %s1802_s20   ;;  %s1327_s19 = sphi %s1398_s19, %s1801_s19   ;;  %s1323_s18 = sphi %s1396_s18, %s1800_s18   ;;  %s1319_s17 = sphi %s1394_s17, %s1799_s17   ;;  %s1315_s16 = sphi %s1392_s16, %s1798_s16   ;;  %s1311_s15 = sphi %s1390_s15, %s1797_s15  }
   0xc   : > { %s32_s29 = sadd.s32 1, %s1347_s24  ;;  %p30_p0 = scmp.ge.s32.totalorder %s29_s28, 2 }
   0xd   : > { %s36_s30 = ssub.s32 1, %s1343_s23  ;;  %s45_s6 = sadd.s32 1, %s1331_s20 }
   0xe   : > { %s37_s5 = smul.u32 %s1347_s24, %s36_s30  ;;  %s1808_s28 = smov (%p30_p0, %s29_s28), 0 }
   0xf   : > { %1783 = sst [smem:[#allocation11_spill]] %s1808_s28  ;;  %s1810_s29 = smov (!%p30_p0, %s32_s29), %s1347_s24 }
  0x10   : > { %s1454_s7 = sadd.s32 %s1343_s23, %s37_s5  ;;  %s39_s8 = ssub.s32 1, %s1808_s28 }
  0x11   : > { %p34_p1 = scmp.ge.s32.totalorder %s1810_s29, 2  ;;  %p52_p2 = scmp.ne.s32.totalorder %s1331_s20, %s1327_s19 }
  0x12   : > { %p53_p3 = scmp.eq.s32.totalorder %s1351_s25, 0  ;;  %p58_p4 = scmp.ne.s32.totalorder %s1327_s19, %s1323_s18 }
  0x13   : > { %s1812_s29 = smov (%p34_p1, %s1810_s29), 0  ;;  %p59_p6 = scmp.eq.s32.totalorder %s941_s26, 0 }
  0x14   : > { %1784 = sst [smem:[#allocation12_spill]] %s1812_s29  ;;  %p1463_p5 = por %p53_p3, %p52_p2 }
  0x15   : > { %s40_s10 = smul.u32 %s39_s8, %s1812_s29  ;;  %s136_s11 = sadd.s32 1, %s1319_s17 }
  0x16   : > { %p1471_p7 = por %p59_p6, %p58_p4  ;;  %s131_s13 = smul.u32 %s1343_s23, %s1347_s24 }
  0x17   : > { %s41_s14 = sadd.s32 %s40_s10, %s1808_s28  ;;  %s132_s18 = smul.u32 %s1812_s29, %s1808_s28 }
  0x18   : > { %s42_s30 = ssub.s32 %s1454_s7, %s41_s14  ;;  %p146_p8 = scmp.ne.s32.totalorder %s1319_s17, %s1315_s16 }
  0x19   : > { %p43_p9 = scmp.eq.s32.totalorder %s42_s30, 0  ;;  %s133_s5 = ssub.s32 %s131_s13, %s132_s18 }
  0x1a   : > { %p134_p10 = scmp.eq.s32.totalorder %s133_s5, 0  ;;  %p147_p11 = scmp.eq.s32.totalorder %s941_s26, 3 }
  0x1b   : > { %s1486_s8 = scalar_select %p43_p9, %s1331_s20, %s45_s6  }
  0x1c   : > { %s1489_s27 = scalar_select %p134_p10, %s1319_s17, %s136_s11  }
  0x1d   : > { %p1491_p12 = por %p147_p11, %p146_p8  ;;  %p152_p13 = scmp.ne.s32.totalorder %s1315_s16, %s1311_s15 }
  0x1e   : > { %s1788_s10 = sadd.s32 4294967294, %s1351_s25   ;;  %p1055_p1 = scmp.lt.s32.totalorder %s1351_s25, 4 }
  0x1f   : > { %s1787_s4 = scalar_select %p1491_p12, 1, 0 }
  0x20   : > { %p153_p0 = scmp.eq.s32.totalorder %s1788_s10, 3  ;;  %s182_s14 = sand.u32 1, %s1331_s20  }
  0x21   : > { %s1040_s13 = smul.u32 144, %s182_s14  ;;  %s945_s26 = sshll.u32 %s1454_s7, 6 }
  0x22   : > { %p1501_p2 = por %p153_p0, %p152_p13  ;;  %s1509_s11 = scalar_lea.hbm %s1773_s0, %s945_s26 }
  0x23   : > { %p1513_p3 = pnand %p1055_p1, %p1463_p5  ;;  %s186_s10 = scalar_lea.vmem [#allocation5], %s1040_s13 }
  0x24   : > { %s1789_s30 = scalar_select %p1501_p2, 1, 0 }
  0x25   : > { %s195_s29 = sshll.u32 %s186_s10, 4  ;;  %s1520_s7 = scalar_lea.sflag [#allocation6], %s182_s14  ;;  %s1517_s29 = int_to_ptr.vmem [resolvable:$true] %s195_s29 }
  0x26   : > { %s1199_s26 = scalar_lea.hbm %s1509_s11, 2304  ;;  %p1201_p8 = pneg %p1513_p3 }
  0x27   : > { %p1200_p6 = scmp.ne.s32.totalorder %s1509_s11, %s1199_s26  ;;  %s1204_s6 = scalar_lea.hbm %s1773_s0, 4608 }
  0x28   : > { %p1205_p10 = scmp.lt.u32.totalorder %s1509_s11, %s1773_s0  ;;  %p1206_p11 = scmp.lt.u32.totalorder %s1204_s6, %s1199_s26 }
  0x29   : > { %p1202_p9 = pnand %p1201_p8, %p1200_p6  ;;  %p1208_p0 = scmp.lt.u32.totalorder %s1199_s26, %s1509_s11 }
  0x2a   : > { %p1207_p13 = por %p1206_p11, %p1205_p10 }
  0x2b   : > { %p1203_p5 = pneg %p1202_p9 }
  0x2c   : > { %p1209_p1 = por %p1208_p0, %p1207_p13 }
  0x2e   : > { %p1210_p4 = pnand %p1209_p1, %p1203_p5 }
  0x30   : > { %1213 = shalt.err (!%p1210_p4)
}
  0x31   : > { %s1214_s14 = scalar_lea.vmem %s1517_s29, 2304  ;;  %s1353_s10 = smov [#allocation5]  }
  0x32   : > { %p1215_p6 = scmp.ne.s32.totalorder %s1517_s29, %s1214_s14  ;;  %s1219_s9 = sshll.u32 %s1353_s10, 4  ;;  %s1220_s9 = int_to_ptr.vmem [resolvable:$false] %s1219_s9 }
  0x33   : > { %s1221_s28 = scalar_lea.vmem %s1220_s9, 4608  ;;  %p1222_p12 = scmp.lt.s32.totalorder %s1517_s29, %s1220_s9 }
  0x34   : > { %p1217_p9 = pnand %p1215_p6, %p1201_p8  ;;  %p1223_p10 = scmp.lt.s32.totalorder %s1221_s28, %s1214_s14 }
  0x36   : > { %p1218_p2 = pneg %p1217_p9  ;;  %p1224_p11 = por %p1223_p10, %p1222_p12 }
  0x38   : > { %p1225_p13 = pnand %p1224_p11, %p1218_p2 }
  0x3a   : > { %1228 = shalt.err (!%p1225_p13)
}
  0x3b   : > { %s1354_s26 = smov 128   ;;  %s1355_s18 = smov 64  }
  0x3c   : > { %s1356_s6 = smov 4   ;;  %p203_p4 = scmp.lt.s32.totalorder %s1351_s25, 5 }
  0x3d   : > { %1050 = dma.hbm_to_vmem [thread:$0]  (!%p1513_p3), %s1509_s11, 2304, %s1517_s29, %s1520_s7, %s1354_s26, %s1355_s18, %s1356_s6  }
  0x3e   : > { %p1791_p8 = scmp.ge.s32.totalorder %s1351_s25, 1 }
  0x40   : > { %p204_p5 = pnand %p1791_p8, %p203_p4 }
  0x41   : > { %s209_s13 = sand.u32 (!%p204_p5), 1, %s1327_s19  }
  0x42   : > { %207 = sbr.rel (%p204_p5) target bundleno = 710 (0x2c6), region = 36  ;;  %s210_s10 = scalar_lea.sflag (!%p204_p5), [#allocation6], %s209_s13 }
  0x43   : > { %s1041_s14 = smul.u32 (!%p204_p5), 144, %s209_s13 }
  0x45   : > { %s1552_s9 = scalar_lea.vmem (!%p204_p5), [#allocation5], %s1041_s14 }
  0x49   : > { %1302 = dma.done.wait (%p1471_p7), %s210_s10, 2304  }
  0x4a   : > { %1304 = vsyncadd (%p1471_p7), %s210_s10, 4294964992  ;;  %s235_s29 = sand.u32 1, %s1315_s16   ;;  %p243_p12 = scmp.eq.s32.totalorder %s1339_s22, 0 }
  0x4b   : > { %s1042_s11 = smul.u32 48, %s235_s29  ;;  %p244_p2 = scmp.eq.s32.totalorder %s1335_s21, 0 }
  0x4d   : > { %p245_p3 = pnand %p244_p2, %p243_p12  ;;  %s1563_s5 = scalar_lea.vmem [#allocation8], %s1042_s11 }
  0x4e   : > { %vm249_vm0 = vcmask (!%p245_p3), 7168   ;;  %v1357_v0 = vmov (!%p245_p3), 0.0  }
  0x4f   : > { %248 = sbr.rel (%p245_p3) target bundleno = 86 (0x56), region = 44  ;;  %250 = vst.msk [vmem:[#allocation3] sm:$0xff] (!%p245_p3), %vm249_vm0, %v1357_v0  ;;  %251 = vst.msk [vmem:[#allocation3 + $0x8] sm:$0xff] (!%p245_p3), %vm249_vm0, %v1357_v0 }
  0x50   : > { %252 = vst.msk [vmem:[#allocation3 + $0x10] sm:$0xff] (!%p245_p3), %vm249_vm0, %v1357_v0  ;;  %253 = vst.msk [vmem:[#allocation3 + $0x18] sm:$0xff] (!%p245_p3), %vm249_vm0, %v1357_v0 }
  0x51   : > { %254 = vst.msk [vmem:[#allocation3 + $0x20] sm:$0xff] (!%p245_p3), %vm249_vm0, %v1357_v0  ;;  %255 = vst.msk [vmem:[#allocation3 + $0x28] sm:$0xff] (!%p245_p3), %vm249_vm0, %v1357_v0 }
  0x52   : > { %256 = vst.msk [vmem:[#allocation4] sm:$0xff] (!%p245_p3), %vm249_vm0, %v1357_v0  ;;  %257 = vst.msk [vmem:[#allocation4 + $0x8] sm:$0xff] (!%p245_p3), %vm249_vm0, %v1357_v0 }
  0x53   : > { %258 = vst.msk [vmem:[#allocation4 + $0x10] sm:$0xff] (!%p245_p3), %vm249_vm0, %v1357_v0  ;;  %259 = vst.msk [vmem:[#allocation4 + $0x18] sm:$0xff] (!%p245_p3), %vm249_vm0, %v1357_v0 }
  0x54   : > { %260 = vst.msk [vmem:[#allocation4 + $0x20] sm:$0xff] (!%p245_p3), %vm249_vm0, %v1357_v0  ;;  %261 = vst.msk [vmem:[#allocation4 + $0x28] sm:$0xff] (!%p245_p3), %vm249_vm0, %v1357_v0 }
  0x56 PF: > { %s947_s12 = sshll.u32 %s1335_s21, 7  ;;  %p948_p7 = scmp.ne.s32.totalorder %s1339_s22, 0 }
  0x57   : > { %v1155_v1 = vld [vmem:[%s1552_s9 + $0x40] sm:$0xff] (!%p948_p7)   ;;  %v1358_v3 = vmov (!%p948_p7), 0.0   ;;  %v1157_v4 = vld [vmem:[%s1552_s9 + $0x48] sm:$0xff] (!%p948_p7)   ;;  %vm1359_vm1 = vmmov (!%p948_p7), 0   ;;  %v1159_v6 = vld [vmem:[%s1552_s9 + $0x50] sm:$0xff] (!%p948_p7)   ;;  %vm467_vm2 = vcmask (!%p948_p7), 261120  }
  0x58   : > { %265 = sbr.rel (%p948_p7) target bundleno = 506 (0x1fa), region = 48  ;;  %v1156_v2 = vld [vmem:[%s1552_s9] sm:$0xff] (!%p948_p7)   ;;  %1024 = vmatprep.subr.bf16.mxu1 (!%p948_p7), %v1358_v3  ;;  %985 = vmatprep.subr.bf16.mxu0 (!%p948_p7), %v1155_v1  ;;  %v1158_v5 = vld [vmem:[%s1552_s9 + $0x8] sm:$0xff] (!%p948_p7)   ;;  %v1160_v7 = vld [vmem:[%s1552_s9 + $0x10] sm:$0xff] (!%p948_p7)   ;;  %s591_s11 = sshra.s32 (!%p948_p7), %s947_s12, 7  ;;  %vm625_vm3 = vcmask (!%p948_p7), 7168  }
  0x59   : > { %1028 = vmatprep.mubr.msk.bf16.mxu1 (!%p948_p7), %vm1359_vm1, %v1358_v3  ;;  %986 = vmatpush3.bf16.msra.mxu0 (!%p948_p7), %v1156_v2  ;;  %v1161_v8 = vld [vmem:[%s1552_s9 + $0x58] sm:$0xff] (!%p948_p7)   ;;  %v1163_v10 = vld [vmem:[%s1552_s9 + $0x60] sm:$0xff] (!%p948_p7)   ;;  %v1165_v13 = vld [vmem:[%s1552_s9 + $0x68] sm:$0xff] (!%p948_p7)   ;;  %s979_s7 = sshll.u32 (!%p948_p7), %s591_s11, 3 }
  0x5a   : > { %987 = vmatprep.subr.bf16.mxu0 (!%p948_p7), %v1157_v4  ;;  %v1162_v9 = vld [vmem:[%s1552_s9 + $0x18] sm:$0xff] (!%p948_p7)   ;;  %v1169_v11 = vld [vmem:[%s1552_s9 + $0x80] sm:$0xff] (!%p948_p7)   ;;  %v1166_v14 = vld [vmem:[%s1552_s9 + $0x28] sm:$0xff] (!%p948_p7)  }
  0x5b   : > { %v1164_v12 = vld [vmem:[%s1552_s9 + $0x20] sm:$0xff] (!%p948_p7)   ;;  %1025 = vmatpush3.bf16.msra.mxu1 (!%p948_p7), %v1169_v11  ;;  %v1172_v15 = vld [vmem:[%s1552_s9 + $0x88] sm:$0xff] (!%p948_p7)   ;;  %v1167_v16 = vld [vmem:[%s1552_s9 + $0x70] sm:$0xff] (!%p948_p7)  }
  0x5c   : > { %1026 = vmatprep.subr.bf16.mxu1 (!%p948_p7), %v1358_v3  ;;  %v1175_v17 = vld [vmem:[%s1774_s1 + $0x4] ss:$12 sps:$4 sm:$0xff] (!%p948_p7)   ;;  %v1176_v18 = vld [vmem:[%s1774_s1 + $0x8] ss:$12 sps:$4 sm:$0xff] (!%p948_p7)   ;;  %v1180_v22 = vld [vmem:[%s1774_s1 + $0x20] ss:$12 sps:$4 sm:$0xff] (!%p948_p7)  }
  0x5d   : > { %988 = vmatpush3.bf16.msra.mxu0 (!%p948_p7), %v1158_v5  ;;  %509 = vmatprep.mubr.bf16.mxu0 (!%p948_p7), %v1175_v17  ;;  %v1168_v19 = vld [vmem:[%s1552_s9 + $0x30] sm:$0xff] (!%p948_p7)   ;;  %v1170_v20 = vld [vmem:[%s1552_s9 + $0x78] sm:$0xff] (!%p948_p7)  }
  0x5e   : > { %989 = vmatprep.subr.bf16.mxu0 (!%p948_p7), %v1159_v6  ;;  %v1171_v21 = vld [vmem:[%s1552_s9 + $0x38] sm:$0xff] (!%p948_p7)   ;;  %v1181_v27 = vld [vmem:[%s1774_s1 + $0x34] ss:$12 sps:$4 sm:$0xff] (!%p948_p7)   ;;  %s1620_s9 = scalar_lea.vmem (!%p948_p7), [#allocation2], %s979_s7 }
  0x5f   : > { %1027 = vmatpush3.bf16.msra.mxu1 %v1172_v15  ;;  %v1173_v23 = vld [vmem:[%s1774_s1] ss:$12 sps:$4 sm:$0xff]   ;;  %v1177_v24 = vld [vmem:[%s1774_s1 + $0x1c] ss:$12 sps:$4 sm:$0xff]   ;;  %v1184_v25 = vld [vmem:[%s1774_s1 + $0x38] ss:$12 sps:$4 sm:$0xff]  }
  0x60   : > { %v1179_v26 = vld [vmem:[%s1774_s1 + $0x18] ss:$12 sps:$4 sm:$0xff]   ;;  %v1183_v28 = vld [vmem:[%s1774_s1 + $0x30] ss:$12 sps:$4 sm:$0xff]   ;;  %v602_v11 = vld [vmem:[#allocation3 + $0x8] sm:$0xff] }
  0x61   : > { %990 = vmatpush3.bf16.msra.mxu0 %v1160_v7  ;;  %v601_v7 = vld [vmem:[#allocation3] sm:$0xff]  ;;  %v632_v17 = vld [vmem:[#allocation4] sm:$0xff] }
  0x62   : > { %991 = vmatprep.subr.bf16.mxu0 %v1161_v8  ;;  %1029 = vmatmul.mubr.msk.bf16.vlgmr.msra.gmra.mrb[0].mxu1 %vm467_vm2, %v1176_v18 }
  0x63   : > { %1032 = vmatprep.mubr.msk.bf16.mxu1 %vm1359_vm1, %v1358_v3 }
  0x65   : > { %992 = vmatpush3.bf16.msra.mxu0 %v1162_v9 }
  0x66   : > { %993 = vmatprep.subr.bf16.mxu0 %v1163_v10  ;;  %v633_v10 = vld [vmem:[#allocation4 + $0x8] sm:$0xff] }
  0x69   : > { %994 = vmatpush3.bf16.msra.mxu0 %v1164_v12 }
  0x6a   : > { %995 = vmatprep.subr.bf16.mxu0 %v1165_v13  ;;  %1033 = vmatmul.mubr.msk.bf16.gmra.mrb[4].mxu1 %vm467_vm2, %v1180_v22  ;;  %v604_v22 = vld [vmem:[#allocation3 + $0x18] sm:$0xff] }
  0x6b   : > { %1036 = vmatprep.mubr.msk.bf16.mxu1 %vm1359_vm1, %v1358_v3 }
  0x6d   : > { %996 = vmatpush3.bf16.msra.mxu0 %v1166_v14 }
  0x6e   : > { %997 = vmatprep.subr.bf16.mxu0 %v1167_v16  ;;  %v603_v16 = vld [vmem:[#allocation3 + $0x10] sm:$0xff] }
  0x71   : > { %998 = vmatpush3.bf16.msra.mxu0 %v1168_v19 }
  0x72   : > { %999 = vmatprep.subr.bf16.mxu0 %v1170_v20  ;;  %1037 = vmatmul.mubr.msk.bf16.gmra.mrb[8].mxu1 %vm467_vm2, %v1184_v25 }
  0x75   : > { %1000 = vmatpush3.bf16.msra.mxu0 %v1171_v21 }
  0x78   : > { %510 = vmatmul.mubr.bf16.vlgmr.msra.gmra.mrb[0].mxu0 %v1173_v23  ;;  %v634_v23 = vld [vmem:[#allocation4 + $0x10] sm:$0xff] }
  0x79   : > { %517 = vmatprep.mubr.bf16.mxu0 %v1177_v24 }
  0x80   : > { %518 = vmatmul.mubr.bf16.gmra.mrb[4].mxu0 %v1179_v26 }
  0x81   : > { %525 = vmatprep.mubr.bf16.mxu0 %v1181_v27 }
  0x88   : > { %526 = vmatmul.mubr.bf16.gmra.mrb[8].mxu0 %v1183_v28  ;;  %v635_v28 = vld [vmem:[#allocation4 + $0x18] sm:$0xff] }
 0x135   : > { %v568_v29 = vpop.f32.mrb[0].mxu1 }
 0x136   : > { %v1030_v30 = vpop.f32.mrb[1].mxu1 }
 0x137   : > { %v571_v31 = vpop.f32.mrb[2].mxu1 }
 0x138   : > { %v1031_v32 = vpop.f32.mrb[3].mxu1 }
 0x13d   : > { %v576_v33 = vpop.f32.mrb[4].mxu1 }
 0x13e   : > { %v1034_v34 = vpop.f32.mrb[5].mxu1 }
 0x13f   : > { %v579_v35 = vpop.f32.mrb[6].mxu1  ;;  %v606_v34 = vld [vmem:[#allocation3 + $0x28] sm:$0xff] }
 0x140   : > { %v1035_v37 = vpop.f32.mrb[7].mxu1 }
 0x145   : > { %v584_v44 = vpop.f32.mrb[8].mxu1 }
 0x146   : > { %v1038_v46 = vpop.f32.mrb[9].mxu1 }
 0x147   : > { %v587_v47 = vpop.f32.mrb[10].mxu1 }
 0x148   : > { %v1039_v50 = vpop.f32.mrb[11].mxu1 }
 0x14b   : > { %v1001_v36 = vpop.f32.mrb[0].mxu0 }
 0x14c   : > { %v1002_v38 = vpop.f32.mrb[1].mxu0 }
 0x14d   : > { %v1003_v39 = vadd.f32 %v1002_v38, %v1001_v36  ;;  %v1004_v40 = vpop.f32.mrb[2].mxu0 }
 0x14e   : > { %v1005_v41 = vpop.f32.mrb[3].mxu0 }
 0x14f   : > { %v569_v42 = vadd.f32 %v1003_v39, %v568_v29  ;;  %v1006_v43 = vadd.f32 %v1005_v41, %v1004_v40  ;;  %v605_v29 = vld [vmem:[#allocation3 + $0x20] sm:$0xff]  ;;  %v637_v40 = vld [vmem:[#allocation4 + $0x28] sm:$0xff] }
 0x151   : > { %595 = vst [vmem:[%s1620_s9] sm:$0xff] %v569_v42  ;;  %v572_v45 = vadd.f32 %v1006_v43, %v571_v31  ;;  %607 = vadd.xlane.f32.xlu0 %v569_v42  ;;  %v638_v57 = vmul.f32 %v569_v42, %v569_v42 }
 0x153   : > { %596 = vst [vmem:[%s1620_s9 + $0x10] sm:$0xff] %v572_v45  ;;  %v1007_v48 = vpop.f32.mrb[4].mxu0  ;;  %v639_v49 = vmul.f32 %v572_v45, %v572_v45 }
 0x154   : > { %v1008_v51 = vpop.f32.mrb[5].mxu0 }
 0x155   : > { %v1009_v52 = vadd.f32 %v1008_v51, %v1007_v48  ;;  %v1010_v53 = vpop.f32.mrb[6].mxu0  ;;  %646 = vadd.xlane.f32.xlu1 %v639_v49  ;;  %609 = vadd.xlane.f32.xlu0 %v572_v45 }
 0x156   : > { %v1011_v54 = vpop.f32.mrb[7].mxu0 }
 0x157   : > { %v577_v55 = vadd.f32 %v1009_v52, %v576_v33  ;;  %v1012_v56 = vadd.f32 %v1011_v54, %v1010_v53 }
 0x159   : > { %597 = vst [vmem:[%s1620_s9 + $0x20] sm:$0xff] %v577_v55  ;;  %v580_v58 = vadd.f32 %v1012_v56, %v579_v35  ;;  %611 = vadd.xlane.f32.xlu1 %v577_v55  ;;  %644 = vadd.xlane.f32.xlu0 %v638_v57  ;;  %v640_v60 = vmul.f32 %v577_v55, %v577_v55  ;;  %v636_v35 = vld [vmem:[#allocation4 + $0x20] sm:$0xff] }
 0x15b   : > { %598 = vst [vmem:[%s1620_s9 + $0x30] sm:$0xff] %v580_v58  ;;  %v1013_v59 = vpop.f32.mrb[8].mxu0  ;;  %v641_v3 = vmul.f32 %v580_v58, %v580_v58 }
 0x15c   : > { %v1014_v61 = vpop.f32.mrb[9].mxu0 }
 0x15d   : > { %v1015_v62 = vadd.f32 %v1014_v61, %v1013_v59  ;;  %v1016_v63 = vpop.f32.mrb[10].mxu0  ;;  %613 = vadd.xlane.f32.xlu1 %v580_v58  ;;  %648 = vadd.xlane.f32.xlu0 %v640_v60 }
 0x15e   : > { %v1017_v0 = vpop.f32.mrb[11].mxu0 }
 0x15f   : > { %v585_v1 = vadd.f32 %v1015_v62, %v584_v44  ;;  %v1018_v2 = vadd.f32 %v1017_v0, %v1016_v63 }
 0x161   : > { %599 = vst [vmem:[%s1620_s9 + $0x40] sm:$0xff] %v585_v1  ;;  %v588_v4 = vadd.f32 %v1018_v2, %v587_v47  ;;  %650 = vadd.xlane.f32.xlu1 %v641_v3  ;;  %615 = vadd.xlane.f32.xlu0 %v585_v1  ;;  %v642_v5 = vmul.f32 %v585_v1, %v585_v1 }
 0x163   : > { %600 = vst [vmem:[%s1620_s9 + $0x50] sm:$0xff] %v588_v4  ;;  %v643_v6 = vmul.f32 %v588_v4, %v588_v4 }
 0x165   : > { %617 = vadd.xlane.f32.xlu1 %v588_v4  ;;  %652 = vadd.xlane.f32.xlu0 %v642_v5 }
 0x169   : > { %654 = vadd.xlane.f32.xlu1 %v643_v6 }
 0x1de   : > { %v608_v8 = vpop.xlane.xlu0 %607 }
 0x1df   : > { %v619_v9 = vadd.f32 %v608_v8, %v601_v7 }
 0x1e1   : > { %626 = vst.msk [vmem:[#allocation3] sm:$0xff] %vm625_vm3, %v619_v9 }
 0x1e2   : > { %v647_v12 = vpop.xlane.xlu1 %646  ;;  %v610_v13 = vpop.xlane.xlu0 %609 }
 0x1e3   : > { %v657_v14 = vadd.f32 %v647_v12, %v633_v10  ;;  %v620_v15 = vadd.f32 %v610_v13, %v602_v11 }
 0x1e5   : > { %663 = vst.msk [vmem:[#allocation4 + $0x8] sm:$0xff] %vm625_vm3, %v657_v14  ;;  %627 = vst.msk [vmem:[#allocation3 + $0x8] sm:$0xff] %vm625_vm3, %v620_v15 }
 0x1e6   : > { %v612_v18 = vpop.xlane.xlu1 %611  ;;  %v645_v19 = vpop.xlane.xlu0 %644 }
 0x1e7   : > { %v621_v20 = vadd.f32 %v612_v18, %v603_v16  ;;  %v656_v21 = vadd.f32 %v645_v19, %v632_v17 }
 0x1e9   : > { %628 = vst.msk [vmem:[#allocation3 + $0x10] sm:$0xff] %vm625_vm3, %v621_v20  ;;  %662 = vst.msk [vmem:[#allocation4] sm:$0xff] %vm625_vm3, %v656_v21 }
 0x1ea   : > { %v614_v24 = vpop.xlane.xlu1 %613  ;;  %v649_v25 = vpop.xlane.xlu0 %648 }
 0x1eb   : > { %v622_v26 = vadd.f32 %v614_v24, %v604_v22  ;;  %v658_v27 = vadd.f32 %v649_v25, %v634_v23 }
 0x1ed   : > { %629 = vst.msk [vmem:[#allocation3 + $0x18] sm:$0xff] %vm625_vm3, %v622_v26  ;;  %664 = vst.msk [vmem:[#allocation4 + $0x10] sm:$0xff] %vm625_vm3, %v658_v27 }
 0x1ee   : > { %v651_v30 = vpop.xlane.xlu1 %650  ;;  %v616_v31 = vpop.xlane.xlu0 %615 }
 0x1ef   : > { %v659_v32 = vadd.f32 %v651_v30, %v635_v28  ;;  %v623_v33 = vadd.f32 %v616_v31, %v605_v29 }
 0x1f1   : > { %665 = vst.msk [vmem:[#allocation4 + $0x18] sm:$0xff] %vm625_vm3, %v659_v32  ;;  %630 = vst.msk [vmem:[#allocation3 + $0x20] sm:$0xff] %vm625_vm3, %v623_v33 }
 0x1f2   : > { %v618_v36 = vpop.xlane.xlu1 %617  ;;  %v653_v37 = vpop.xlane.xlu0 %652 }
 0x1f3   : > { %v624_v38 = vadd.f32 %v618_v36, %v606_v34  ;;  %v660_v39 = vadd.f32 %v653_v37, %v636_v35 }
 0x1f5   : > { %631 = vst.msk [vmem:[#allocation3 + $0x28] sm:$0xff] %vm625_vm3, %v624_v38  ;;  %666 = vst.msk [vmem:[#allocation4 + $0x20] sm:$0xff] %vm625_vm3, %v660_v39 }
 0x1f6   : > { %v655_v41 = vpop.xlane.xlu1 %654 }
 0x1f7   : > { %v661_v42 = vadd.f32 %v655_v41, %v637_v40 }
 0x1f9   : > { %667 = vst.msk [vmem:[#allocation4 + $0x28] sm:$0xff] %vm625_vm3, %v661_v42 }
 0x1fa PF: > { %p980_p0 = scmp.ne.s32.totalorder %s1339_s22, 1 }
 0x1fb   : > { %v674_v43 = vld [vmem:[#allocation3 + $0x10] sm:$0xff] (!%p980_p0)  ;;  %v686_v44 = vld [vmem:[#allocation4 + $0x10] sm:$0xff] (!%p980_p0)  ;;  %v1360_v45 = vmov (!%p980_p0), 0   ;;  %v675_v52 = vld [vmem:[#allocation3 + $0x18] sm:$0xff] (!%p980_p0)  ;;  %s750_s13 = sshra.s32 (!%p980_p0), %s947_s12, 7 }
 0x1fc   : > { %671 = sbr.rel (%p980_p0) target bundleno = 681 (0x2a9), region = 52  ;;  %1186 = vset.pattern.permute.xlu1 (!%p980_p0), %v1360_v45  ;;  %1185 = vset.pattern.permute.xlu0 (!%p980_p0), %v1360_v45  ;;  %v1641_v46 = vmul.f32 (!%p980_p0), 0.00390625, %v674_v43  ;;  %v692_v47 = vmul.f32 (!%p980_p0), 0.00390625, %v686_v44  ;;  %v672_v48 = vld [vmem:[#allocation3] sm:$0xff] (!%p980_p0)  ;;  %v684_v49 = vld [vmem:[#allocation4] sm:$0xff] (!%p980_p0)  ;;  %v687_v53 = vld [vmem:[#allocation4 + $0x18] sm:$0xff] (!%p980_p0) }
 0x1fd   : > { %v1643_v50 = vmul.f32 (!%p980_p0), 0.00390625, %v672_v48  ;;  %v690_v51 = vmul.f32 (!%p980_p0), 0.00390625, %v684_v49  ;;  %v1647_v55 = vmul.f32 (!%p980_p0), 0.00390625, %v675_v52  ;;  %v693_v56 = vmul.f32 (!%p980_p0), 0.00390625, %v687_v53  ;;  %v673_v57 = vld [vmem:[#allocation3 + $0x8] sm:$0xff] (!%p980_p0)  ;;  %v685_v58 = vld [vmem:[#allocation4 + $0x8] sm:$0xff] (!%p980_p0) }
 0x1fe   : > { %v698_v54 = vmul.f32 (!%p980_p0), %v1641_v46, %v1641_v46  ;;  %v679_v60 = vmul.f32 (!%p980_p0), 0.00390625, %v673_v57  ;;  %v691_v61 = vmul.f32 (!%p980_p0), 0.00390625, %v685_v58  ;;  %v677_v62 = vld [vmem:[#allocation3 + $0x28] sm:$0xff] (!%p980_p0)  ;;  %v676_v4 = vld [vmem:[#allocation3 + $0x20] sm:$0xff] (!%p980_p0)  ;;  %v688_v5 = vld [vmem:[#allocation4 + $0x20] sm:$0xff] (!%p980_p0)  ;;  %s981_s14 = sshll.u32 (!%p980_p0), %s750_s13, 3 }
 0x1ff   : > { %v696_v59 = vmul.f32 (!%p980_p0), %v1643_v50, %v1643_v50  ;;  %v699_v1 = vmul.f32 (!%p980_p0), %v1647_v55, %v1647_v55  ;;  %v683_v2 = vmul.f32 (!%p980_p0), 0.00390625, %v677_v62  ;;  %v682_v8 = vmul.f32 (!%p980_p0), 0.00390625, %v676_v4  ;;  %v710_v22 = vld [vmem:[%s1775_s2 + $0x10] sm:$0xff] (!%p980_p0)  ;;  %v708_v23 = vld [vmem:[%s1775_s2] sm:$0xff] (!%p980_p0)  ;;  %v711_v25 = vld [vmem:[%s1775_s2 + $0x18] sm:$0xff] (!%p980_p0)  ;;  %s753_s10 = scalar_lea.vmem (!%p980_p0), [#allocation2], %s981_s14 }
 0x200   : > { %v689_v63 = vld [vmem:[#allocation4 + $0x28] sm:$0xff] (!%p980_p0)  ;;  %v704_v0 = vsub.f32 (!%p980_p0), %v692_v47, %v698_v54  ;;  %v697_v7 = vmul.f32 (!%p980_p0), %v679_v60, %v679_v60  ;;  %v694_v9 = vmul.f32 (!%p980_p0), 0.00390625, %v688_v5  ;;  %v709_v28 = vld [vmem:[%s1775_s2 + $0x8] sm:$0xff] (!%p980_p0)  ;;  %v712_v37 = vld [vmem:[%s1775_s2 + $0x20] sm:$0xff] (!%p980_p0) }
 0x201   : > { %v695_v3 = vmul.f32 (!%p980_p0), 0.00390625, %v689_v63  ;;  %v702_v6 = vsub.f32 (!%p980_p0), %v690_v51, %v696_v59  ;;  %v705_v11 = vsub.f32 (!%p980_p0), %v693_v56, %v699_v1  ;;  %v701_v12 = vmul.f32 (!%p980_p0), %v683_v2, %v683_v2  ;;  %v713_v35 = vld [vmem:[%s1775_s2 + $0x28] sm:$0xff] (!%p980_p0)  ;;  %v732_v43 = vld [vmem:[%s1776_s3] sm:$0xff] (!%p980_p0)  ;;  %v735_v49 = vld [vmem:[%s1776_s3 + $0x18] sm:$0xff] (!%p980_p0) }
 0x202   : > { %v716_v10 = vadd.f32 (!%p980_p0), 0.001, %v704_v0  ;;  %v703_v14 = vsub.f32 (!%p980_p0), %v691_v61, %v697_v7  ;;  %v700_v15 = vmul.f32 (!%p980_p0), %v682_v8, %v682_v8  ;;  %v733_v42 = vld [vmem:[%s1776_s3 + $0x8] sm:$0xff] (!%p980_p0)  ;;  %v755_v62 = vld [vmem:[%s753_s10 + $0x10] sm:$0xff] (!%p980_p0)  ;;  %v754_v0 = vld [vmem:[%s753_s10] sm:$0xff] (!%p980_p0) }
 0x203   : > { %v714_v13 = vadd.f32 0.001, %v702_v6  ;;  %v717_v16 = vadd.f32 0.001, %v705_v11  ;;  %v707_v17 = vsub.f32 %v695_v3, %v701_v12  ;;  %v757_v4 = vld [vmem:[%s753_s10 + $0x30] sm:$0xff]  ;;  %v756_v6 = vld [vmem:[%s753_s10 + $0x20] sm:$0xff] }
 0x204   : > { %1187 = vrsqrt.f32 %v716_v10  ;;  %v715_v18 = vadd.f32 0.001, %v703_v14  ;;  %v706_v19 = vsub.f32 %v694_v9, %v700_v15  ;;  %v759_v12 = vld [vmem:[%s753_s10 + $0x50] sm:$0xff]  ;;  %v758_v14 = vld [vmem:[%s753_s10 + $0x40] sm:$0xff] }
 0x205   : > { %1189 = vrsqrt.f32 %v714_v13  ;;  %v719_v20 = vadd.f32 0.001, %v707_v17 }
 0x206   : > { %1191 = vrsqrt.f32 %v717_v16  ;;  %v718_v21 = vadd.f32 0.001, %v706_v19 }
 0x207   : > { %1193 = vrsqrt.f32 %v715_v18 }
 0x208   : > { %1195 = vrsqrt.f32 %v719_v20 }
 0x209   : > { %1197 = vrsqrt.f32 %v718_v21 }
 0x20e   : > { %v1188_v24 = vpop.eup %1187 }
 0x20f   : > { %v1190_v26 = vpop.eup %1189  ;;  %v728_v27 = vmul.f32 %v1188_v24, %v710_v22 }
 0x210   : > { %v1192_v29 = vpop.eup %1191  ;;  %v726_v30 = vmul.f32 %v1190_v26, %v708_v23 }
 0x211   : > { %v1194_v31 = vpop.eup %1193  ;;  %772 = vperm.xlu1 %1186, %v728_v27   ;;  %v729_v32 = vmul.f32 %v1192_v29, %v711_v25  ;;  %v740_v47 = vmul.f32 %v728_v27, %v1641_v46  ;;  %v737_v46 = vld [vmem:[%s1776_s3 + $0x28] sm:$0xff] }
 0x212   : > { %v1196_v33 = vpop.eup %1195  ;;  %762 = vperm.xlu0 %1185, %v726_v30   ;;  %v727_v34 = vmul.f32 %v1194_v31, %v709_v28  ;;  %v738_v40 = vmul.f32 %v726_v30, %v1643_v50  ;;  %v734_v50 = vld [vmem:[%s1776_s3 + $0x10] sm:$0xff] }
 0x213   : > { %v1198_v36 = vpop.eup %1197  ;;  %v731_v38 = vmul.f32 %v1196_v33, %v713_v35  ;;  %v741_v45 = vmul.f32 %v729_v32, %v1647_v55  ;;  %v746_v53 = vsub.f32 %v734_v50, %v740_v47  ;;  %v736_v55 = vld [vmem:[%s1776_s3 + $0x20] sm:$0xff] }
 0x214   : > { %v739_v39 = vmul.f32 %v727_v34, %v679_v60  ;;  %v730_v41 = vmul.f32 %v1198_v36, %v712_v37  ;;  %v744_v48 = vsub.f32 %v732_v43, %v738_v40 }
 0x215   : > { %777 = vperm.xlu1 %1186, %v729_v32   ;;  %v747_v51 = vsub.f32 %v735_v49, %v741_v45  ;;  %v743_v52 = vmul.f32 %v731_v38, %v683_v2 }
 0x216   : > { %767 = vperm.xlu0 %1185, %v727_v34   ;;  %v745_v44 = vsub.f32 %v733_v42, %v739_v39  ;;  %v742_v54 = vmul.f32 %v730_v41, %v682_v8 }
 0x217   : > { %v749_v56 = vsub.f32 %v737_v46, %v743_v52 }
 0x218   : > { %v748_v57 = vsub.f32 %v736_v55, %v742_v54 }
 0x219   : > { %787 = vperm.xlu1 %1186, %v731_v38  }
 0x21a   : > { %782 = vperm.xlu0 %1185, %v730_v41  }
 0x21d   : > { %803 = vperm.xlu1 %1186, %v745_v44  }
 0x21e   : > { %798 = vperm.xlu0 %1185, %v744_v48  }
 0x221   : > { %813 = vperm.xlu1 %1186, %v747_v51  }
 0x222   : > { %808 = vperm.xlu0 %1185, %v746_v53  }
 0x225   : > { %823 = vperm.xlu1 %1186, %v749_v56  }
 0x226   : > { %818 = vperm.xlu0 %1185, %v748_v57  }
 0x290   : > { %v773_v58 = vpop.permute.xlu1 %772 }
 0x291   : > { %v763_v59 = vpop.permute.xlu0 %762  ;;  %v792_v11 = vmul.f32 %v773_v58, %v756_v6 }
 0x292   : > { %v790_v3 = vmul.f32 %v763_v59, %v754_v0 }
 0x294   : > { %v778_v60 = vpop.permute.xlu1 %777 }
 0x295   : > { %v768_v61 = vpop.permute.xlu0 %767  ;;  %v793_v10 = vmul.f32 %v778_v60, %v757_v4 }
 0x296   : > { %v791_v2 = vmul.f32 %v768_v61, %v755_v62 }
 0x298   : > { %v788_v63 = vpop.permute.xlu1 %787 }
 0x299   : > { %v783_v1 = vpop.permute.xlu0 %782  ;;  %v795_v18 = vmul.f32 %v788_v63, %v759_v12 }
 0x29a   : > { %v794_v19 = vmul.f32 %v783_v1, %v758_v14 }
 0x29c   : > { %v804_v5 = vpop.permute.xlu1 %803 }
 0x29d   : > { %v827_v7 = vadd.f32 %v804_v5, %v791_v2  ;;  %v799_v8 = vpop.permute.xlu0 %798 }
 0x29e   : > { %v826_v9 = vadd.f32 %v799_v8, %v790_v3 }
 0x29f   : > { %833 = vst [vmem:[%s1563_s5 + $0x8] sm:$0xff] %v827_v7 }
 0x2a0   : > { %832 = vst [vmem:[%s1563_s5] sm:$0xff] %v826_v9  ;;  %v814_v13 = vpop.permute.xlu1 %813 }
 0x2a1   : > { %v829_v15 = vadd.f32 %v814_v13, %v793_v10  ;;  %v809_v16 = vpop.permute.xlu0 %808 }
 0x2a2   : > { %v828_v17 = vadd.f32 %v809_v16, %v792_v11 }
 0x2a3   : > { %835 = vst [vmem:[%s1563_s5 + $0x18] sm:$0xff] %v829_v15 }
 0x2a4   : > { %834 = vst [vmem:[%s1563_s5 + $0x10] sm:$0xff] %v828_v17  ;;  %v824_v20 = vpop.permute.xlu1 %823 }
 0x2a5   : > { %v831_v21 = vadd.f32 %v824_v20, %v795_v18  ;;  %v819_v22 = vpop.permute.xlu0 %818 }
 0x2a6   : > { %v830_v23 = vadd.f32 %v819_v22, %v794_v19 }
 0x2a7   : > { %837 = vst [vmem:[%s1563_s5 + $0x28] sm:$0xff] %v831_v21 }
 0x2a8   : > { %836 = vst [vmem:[%s1563_s5 + $0x20] sm:$0xff] %v830_v23 }
 0x2a9 PF: > { %s846_s12 = smul.u32 %s1335_s21, %s1339_s22  ;;  %s852_s11 = sshll.u32 %s1563_s5, 4  ;;  %s1703_s11 = int_to_ptr.vmem [resolvable:$true] %s852_s11 }
 0x2aa   : > { %s1792_s26 = sld [smem:[#allocation13_spill]]  ;;  %s1712_s6 = scalar_lea.sflag [#allocation7], %s235_s29 }
 0x2ab   : > { %s982_s7 = sshll.u32 %s846_s12, 7  ;;  %s1229_s13 = scalar_lea.vmem %s1703_s11, 768 }
 0x2ac   : > { %p1230_p1 = scmp.ne.s32.totalorder %s1703_s11, %s1229_s13  ;;  %p1793_p6 = scmp.ne.s32.totalorder %s1787_s4, 0 }
 0x2ad   : > { %s1361_s21 = smov [#allocation8]  }
 0x2ae   : > { %p1231_p9 = pnand %p1230_p1, %p1793_p6  ;;  %s1233_s22 = sshll.u32 %s1361_s21, 4  ;;  %s1234_s22 = int_to_ptr.vmem [resolvable:$false] %s1233_s22 }
 0x2af   : > { %s1235_s5 = scalar_lea.vmem %s1234_s22, 1536  ;;  %p1236_p11 = scmp.lt.s32.totalorder %s1703_s11, %s1234_s22 }
 0x2b0   : > { %s1708_s18 = scalar_lea.hbm %s1792_s26, %s982_s7  ;;  %p1232_p10 = pneg %p1231_p9 }
 0x2b1   : > { %p1237_p13 = scmp.lt.s32.totalorder %s1235_s5, %s1229_s13 }
 0x2b3   : > { %p1238_p4 = por %p1237_p13, %p1236_p11 }
 0x2b5   : > { %p1239_p8 = pnand %p1238_p4, %p1232_p10 }
 0x2b7   : > { %1242 = shalt.err (!%p1239_p8)
}
 0x2b8   : > { %s1243_s29 = scalar_lea.hbm %s1708_s18, 768  ;;  %s1247_s12 = scalar_lea.hbm %s1792_s26, 1536 }
 0x2b9   : > { %p1244_p5 = scmp.ne.s32.totalorder %s1708_s18, %s1243_s29  ;;  %p1248_p3 = scmp.lt.u32.totalorder %s1708_s18, %s1792_s26 }
 0x2ba   : > { %p1249_p7 = scmp.lt.u32.totalorder %s1247_s12, %s1243_s29  ;;  %p1251_p1 = scmp.lt.u32.totalorder %s1243_s29, %s1708_s18 }
 0x2bb   : > { %p1245_p12 = pnand %p1244_p5, %p1793_p6 }
 0x2bc   : > { %p1250_p0 = por %p1249_p7, %p1248_p3 }
 0x2bd   : > { %p1246_p2 = pneg %p1245_p12 }
 0x2be   : > { %p1252_p9 = por %p1251_p1, %p1250_p0 }
 0x2c0   : > { %p1253_p10 = pnand %p1252_p9, %p1246_p2 }
 0x2c2   : > { %1256 = shalt.err (!%p1253_p10)
}
 0x2c3   : > { %s1362_s28 = smov 128   ;;  %s1363_s13 = smov 256  }
 0x2c4   : > { %s1364_s21 = smov 8  }
 0x2c5   : > { %1045 = dma.vmem_to_hbm [thread:$0]  (%p1793_p6), %s1703_s11, 768, %s1708_s18, %s1712_s6, %s1362_s28, %s1363_s13, %s1364_s21  }
 0x2c6 PF: > { %p1056_p11 = scmp.ge.s32.totalorder %s1351_s25, 2  ;;  %s867_s22 = sand.u32 1, %s1311_s15  }
 0x2c7   : > { %p1794_p13 = scmp.ne.s32.totalorder %s1789_s30, 0  ;;  %s868_s5 = scalar_lea.sflag [#allocation7], %s867_s22 }
 0x2c9   : > { %p1052_p4 = pnand %p1056_p11, %p1794_p13 }
 0x2cb   : > { %1306 = dma.done.wait (!%p1052_p4), %s868_s5, 768  }
 0x2cc   : > { %1308 = vsyncadd (!%p1052_p4), %s868_s5, 4294966528  ;;  %s20_s25 = sadd.s32 1, %s1351_s25   ;;  %s1795_s4 = sld [smem:[#allocation11_spill]] }
 0x2cd   : > { %p17_p8 = scmp.ge.s32.totalorder %s20_s25, 6   ;;  %s1796_s11 = sld [smem:[#allocation12_spill]] }
 0x2ce   : > { %s1797_s15 = smov %s1315_s16  ;;  %s1798_s16 = smov %s1319_s17 }
 0x2cf   : > { %s1799_s17 = smov %s1489_s27  ;;  %s1800_s18 = smov %s1327_s19 }
 0x2d0   : > { %s1801_s19 = smov %s1331_s20  ;;  %s1802_s20 = smov %s1486_s8 }
 0x2d1   : > { %s1803_s21 = smov %s1343_s23  ;;  %s1804_s22 = smov %s1347_s24 }
 0x2d2   : > { %s1805_s23 = smov %s1795_s4  ;;  %19 = sbr.rel (!%p17_p8) target bundleno = 11 (0xb), region = 95 }
 0x2d3   : > { %s1806_s24 = smov %s1796_s11 }
 0x2d9   :  { %873 = vsyncpa [#allocation6], 1 }
 0x2da   :  { %875 = vsyncpa [#allocation6 + $0x1], 1 }
 0x2db   :  { %876 = vsyncpa [#allocation7], 1 }
 0x2dc   :  { %878 = vsyncpa [#allocation7 + $0x1], 1 }

</bundles_post_ra>
